<compile_context>
chip_gen: v5e
topology: v5e:2x2
jax: 0.10.0
libtpu: 0.0.40
codegen_flags: <defaults>
</compile_context>

<pallas_src>
import jax
import jax.numpy as jnp
from jax.experimental import pallas as pl
from jax.experimental.pallas import tpu as pltpu


def _round_up(x, m):
    return (x + m - 1) // m * m


def attn_net_kernel(x_ref, w1_ref, b1_ref, w2_ref, b2_ref, s_ref):
    # Linear(L -> D) + Tanh.  (Dropout p=0.0 is identity.)
    # NOTE: x / w1 could be fed as bf16 (keeping preferred_element_type=f32) to
    # halve HBM traffic on the streamed tensor; kept f32 for exact parity with
    # the f32 reference.
    h = jnp.tanh(
        jnp.dot(x_ref[...], w1_ref[...], preferred_element_type=jnp.float32)
        + b1_ref[...])                                            # (TILE_N, D)
    # Linear(D -> n_classes_padded): raw attention scores, lane-dense output.
    s_ref[...] = (
        jnp.dot(h, w2_ref[...], preferred_element_type=jnp.float32)
        + b2_ref[...])                                            # (TILE_N, NCP)


def attn_net_forward(x, params, *, tile_n=512):
    """x: (N, L) float32.  Returns (A (n_classes, N, N), x), matching Attn_Net."""
    N, L = x.shape
    D = params["w1"].shape[1]
    n_classes = params["w2"].shape[1]

    # Lane-pad the classifier width to 128 (lane-dense matmul + unmasked stores).
    ncp = _round_up(max(n_classes, 1), 128)
    w2 = jnp.pad(params["w2"], ((0, 0), (0, ncp - n_classes)))
    b2 = jnp.pad(params["b2"], ((0, 0), (0, ncp - n_classes)))

    # Tile / pad the patch axis (tile must be sublane-aligned or the full dim).
    tn = min(tile_n, _round_up(N, 8))
    n_pad = _round_up(N, tn)
    x_p = jnp.pad(x, ((0, n_pad - N), (0, 0))) if n_pad != N else x
    grid = (n_pad // tn,)

    scores = pl.pallas_call(
        attn_net_kernel,
        out_shape=jax.ShapeDtypeStruct((n_pad, ncp), jnp.float32),
        grid=grid,
        in_specs=[
            pl.BlockSpec((tn, L), lambda i: (i, 0)),    # x: streamed per tile
            pl.BlockSpec((L, D), lambda i: (0, 0)),     # w1: resident
            pl.BlockSpec((1, D), lambda i: (0, 0)),     # b1: resident
            pl.BlockSpec((D, ncp), lambda i: (0, 0)),   # w2 (lane-padded): resident
            pl.BlockSpec((1, ncp), lambda i: (0, 0)),   # b2 (lane-padded): resident
        ],
        out_specs=pl.BlockSpec((tn, ncp), lambda i: (i, 0)),
        compiler_params=pltpu.CompilerParams(
            dimension_semantics=("parallel",)),
    )(x_p, params["w1"], params["b1"], w2, b2)

    s = scores[:N, :n_classes]                          # (N, n_classes) raw scores

    # Assemble the (n_classes, N, N) diagonal attention matrices OUTSIDE the
    # kernel (cheap XLA op; keeps the O(N^2) object out of kernel VMEM/writeback).
    eye = jnp.eye(N, dtype=s.dtype)
    A = s.T[:, :, None] * eye[None, :, :]               # A[c, i, i] = s[i, c]
    return A, x


def reference_forward(x, p):
    """Pure-JAX reference matching the torch Attn_Net forward."""
    h = jnp.tanh(x @ p["w1"] + p["b1"])
    s = h @ p["w2"] + p["b2"]                           # (N, n_classes)
    N, nc = x.shape[0], s.shape[1]
    idx = jnp.arange(N)
    A = jnp.zeros((nc, N, N), s.dtype).at[:, idx, idx].set(s.T)
    return A, x


if __name__ == "__main__":
    # Small shapes consistent with the module (torch defaults: L=1024, D=256,
    # n_classes=1), scaled down; N is deliberately not a multiple of the tile
    # so the padding + multi-tile grid path is exercised.
    N, L, D, N_CLASSES = 100, 256, 128, 1

    key = jax.random.PRNGKey(0)
    kx, k1, k2, k3, k4 = jax.random.split(key, 5)
    x = jax.random.normal(kx, (N, L), jnp.float32)
    params = {
        "w1": jax.random.normal(k1, (L, D), jnp.float32) * (1.0 / L) ** 0.5,
        "b1": jax.random.normal(k2, (1, D), jnp.float32) * 0.01,
        "w2": jax.random.normal(k3, (D, N_CLASSES), jnp.float32) * (1.0 / D) ** 0.5,
        "b2": jax.random.normal(k4, (1, N_CLASSES), jnp.float32) * 0.01,
    }

    A, x_out = attn_net_forward(x, params, tile_n=32)   # 4 tiles of 32 rows
    A = jax.block_until_ready(A)
    x_out = jax.block_until_ready(x_out)

    ref_A, ref_x = reference_forward(x, params)
    assert A.shape == (N_CLASSES, N, N)
    assert x_out.shape == x.shape
    assert jnp.allclose(A, ref_A, atol=1e-4, rtol=1e-4)
    assert jnp.array_equal(x_out, ref_x)

    print("KERNEL_OK")
</pallas_src>

<mosaic_0001>
module attributes {stable_mosaic.version = 11 : i64} {
  func.func @attn_net_kernel(%arg0: i32, %arg1: memref<32x256xf32, #tpu.memory_space<vmem>>, %arg2: memref<256x128xf32, #tpu.memory_space<vmem>>, %arg3: memref<1x128xf32, #tpu.memory_space<vmem>>, %arg4: memref<128x128xf32, #tpu.memory_space<vmem>>, %arg5: memref<1x128xf32, #tpu.memory_space<vmem>>, %arg6: memref<32x128xf32, #tpu.memory_space<vmem>>) attributes {dimension_semantics = [#tpu.dimension_semantics<parallel>], iteration_bounds = array<i64: 4>, scalar_prefetch = 0 : i64, scratch_operands = 0 : i64, tpu.core_type = #tpu.core_type<tc>, window_params = [{transform_indices = @transform_0, window_bounds = array<i64: 32, 256>}, {pipeline_mode = #tpu.pipeline_mode<synchronous>, transform_indices = @transform_1, window_bounds = array<i64: 256, 128>}, {pipeline_mode = #tpu.pipeline_mode<synchronous>, transform_indices = @transform_2, window_bounds = array<i64: 1, 128>}, {pipeline_mode = #tpu.pipeline_mode<synchronous>, transform_indices = @transform_3, window_bounds = array<i64: 128, 128>}, {pipeline_mode = #tpu.pipeline_mode<synchronous>, transform_indices = @transform_4, window_bounds = array<i64: 1, 128>}, {transform_indices = @transform_5, window_bounds = array<i64: 32, 128>}]} {
    %c0 = arith.constant 0 : index
    %c0_0 = arith.constant 0 : index
    %0 = vector.load %arg1[%c0, %c0_0] : memref<32x256xf32, #tpu.memory_space<vmem>>, vector<32x256xf32>
    %c0_1 = arith.constant 0 : index
    %c0_2 = arith.constant 0 : index
    %1 = vector.load %arg2[%c0_1, %c0_2] : memref<256x128xf32, #tpu.memory_space<vmem>>, vector<256x128xf32>
    %cst = arith.constant dense<0.000000e+00> : vector<32x128xf32>
    %2 = tpu.matmul %0, %1, %cst {dimension_numbers = #tpu.dot_dimension_numbers<[1], [0], [0], [1], [0, 0, 1, 1], [], []>} : vector<32x256xf32>, vector<256x128xf32>, vector<32x128xf32> -> vector<32x128xf32>
    %c0_3 = arith.constant 0 : index
    %c0_4 = arith.constant 0 : index
    %3 = vector.load %arg3[%c0_3, %c0_4] : memref<1x128xf32, #tpu.memory_space<vmem>>, vector<1x128xf32>
    %4 = vector.broadcast %3 : vector<1x128xf32> to vector<32x128xf32>
    %5 = arith.addf %2, %4 : vector<32x128xf32>
    %6 = math.tanh %5 : vector<32x128xf32>
    %c0_5 = arith.constant 0 : index
    %c0_6 = arith.constant 0 : index
    %7 = vector.load %arg4[%c0_5, %c0_6] : memref<128x128xf32, #tpu.memory_space<vmem>>, vector<128x128xf32>
    %cst_7 = arith.constant dense<0.000000e+00> : vector<32x128xf32>
    %8 = tpu.matmul %6, %7, %cst_7 {dimension_numbers = #tpu.dot_dimension_numbers<[1], [0], [0], [1], [0, 0, 1, 1], [], []>} : vector<32x128xf32>, vector<128x128xf32>, vector<32x128xf32> -> vector<32x128xf32>
    %c0_8 = arith.constant 0 : index
    %c0_9 = arith.constant 0 : index
    %9 = vector.load %arg5[%c0_8, %c0_9] : memref<1x128xf32, #tpu.memory_space<vmem>>, vector<1x128xf32>
    %10 = vector.broadcast %9 : vector<1x128xf32> to vector<32x128xf32>
    %11 = arith.addf %8, %10 : vector<32x128xf32>
    %c0_10 = arith.constant 0 : index
    %c0_11 = arith.constant 0 : index
    %12 = vector.load %arg6[%c0_10, %c0_11] : memref<32x128xf32, #tpu.memory_space<vmem>>, vector<32x128xf32>
    tpu.vector_store %arg6[%c0_10, %c0_11], %11 {strides = array<i32>} : memref<32x128xf32, #tpu.memory_space<vmem>>, vector<32x128xf32>,
    return
  }
  func.func @transform_0(%arg0: i32) -> (i32, i32) {
    %c0_i32 = arith.constant 0 : i32
    %c0_i32_0 = arith.constant 0 : i32
    return %arg0, %c0_i32 : i32, i32
  }
  func.func @transform_1(%arg0: i32) -> (i32, i32) {
    %c0_i32 = arith.constant 0 : i32
    %c0_i32_0 = arith.constant 0 : i32
    %c0_i32_1 = arith.constant 0 : i32
    return %c0_i32, %c0_i32_0 : i32, i32
  }
  func.func @transform_2(%arg0: i32) -> (i32, i32) {
    %c0_i32 = arith.constant 0 : i32
    %c0_i32_0 = arith.constant 0 : i32
    %c0_i32_1 = arith.constant 0 : i32
    return %c0_i32, %c0_i32_0 : i32, i32
  }
  func.func @transform_3(%arg0: i32) -> (i32, i32) {
    %c0_i32 = arith.constant 0 : i32
    %c0_i32_0 = arith.constant 0 : i32
    %c0_i32_1 = arith.constant 0 : i32
    return %c0_i32, %c0_i32_0 : i32, i32
  }
  func.func @transform_4(%arg0: i32) -> (i32, i32) {
    %c0_i32 = arith.constant 0 : i32
    %c0_i32_0 = arith.constant 0 : i32
    %c0_i32_1 = arith.constant 0 : i32
    return %c0_i32, %c0_i32_0 : i32, i32
  }
  func.func @transform_5(%arg0: i32) -> (i32, i32) {
    %c0_i32 = arith.constant 0 : i32
    %c0_i32_0 = arith.constant 0 : i32
    return %arg0, %c0_i32 : i32, i32
  }
}

</mosaic_0001>

<bundles_post_ra>
// kernel: tpu_custom_call.1
= control target key start
LH: loop header
LB: loop body
LE: loop exit
PB: predicated region body
PF: predicated region fallthrough
CT: control target
= control target key end

     0   :  { %10 = vsyncpa [#allocation3], 0  ;;  %s1025_s0 = inlined_call_operand.hbm [shape: f32[128,256], index: 0, kind: input, shape index: {}]   ;;  %s1026_s1 = inlined_call_operand.hbm [shape: f32[256,128], index: 1, kind: input, shape index: {}]   ;;  %s1027_s2 = inlined_call_operand.vmem [shape: f32[1,128], index: 2, kind: input, shape index: {}]   ;;  %s1028_s3 = inlined_call_operand.hbm [shape: f32[128,128], index: 3, kind: input, shape index: {}]   ;;  %s1029_s4 = inlined_call_operand.vmem [shape: f32[1,128], index: 4, kind: input, shape index: {}]   ;;  %s1030_s5 = inlined_call_operand.hbm [shape: f32[128,128], index: 5, kind: output, shape index: {}]  }
   0x1   :  { %12 = vsyncpa [#allocation3 + $0x1], 0 }
   0x2   :  { %13 = vsyncpa [#allocation6], 0 }
   0x3   :  { %14 = vsyncpa [#allocation4], 0 }
   0x4   :  { %16 = vsyncpa [#allocation4 + $0x1], 0  ;;  %s869_s18 = smov 0   ;;  %s871_s19 = smov 0  }
   0x5   :  { %s873_s20 = smov 0   ;;  %s875_s21 = smov 0  }
   0x6 LB: > { %s890_s22 = sadd.s32 4294967295, %s829_s21   ;;  %s548_s23 = sadd.s32 4294967294, %s829_s21   ;;  %s829_s21 = sphi %s875_s21, %s1039_s21   ;;  %s825_s20 = sphi %s873_s20, %s1038_s20   ;;  %s821_s19 = sphi %s871_s19, %s1037_s19   ;;  %s817_s18 = sphi %s869_s18, %s1036_s18  }
   0x7   : > { %p42_p0 = scmp.ne.s32.totalorder %s821_s19, %s817_s18  ;;  %p43_p1 = scmp.eq.s32.totalorder %s890_s22, 0 }
   0x8   : > { %p150_p2 = scmp.eq.s32.totalorder %s890_s22, 3  ;;  %p156_p3 = scmp.eq.s32.totalorder %s548_s23, 3 }
   0x9   : > { %p899_p4 = por %p43_p1, %p42_p0  ;;  %p549_p5 = scmp.ge.s32.totalorder %s829_s21, 1 }
   0xa   : > { %p904_p6 = por %p156_p3, %p42_p0  ;;  %p163_p7 = scmp.lt.s32.totalorder %s829_s21, 5 }
   0xb   : > { %s174_s28 = sshll.u32 %s1026_s1, 4  ;;  %s831_s30 = smov [#allocation5]   ;;  %s175_s28 = int_to_ptr.hbm [resolvable:$true] %s174_s28 }
   0xc   : > { %p912_p8 = pnand %p549_p5, %p163_p7  ;;  %s176_s6 = sshll.u32 %s831_s30, 4  ;;  %s177_s6 = int_to_ptr.vmem [resolvable:$true] %s176_s6 }
   0xd   : > { %s191_s9 = sshll.u32 %s1028_s3, 4  ;;  %s832_s10 = smov 128   ;;  %s192_s9 = int_to_ptr.hbm [resolvable:$true] %s191_s9 }
   0xe   : > { %p598_p9 = pneg %p912_p8  ;;  %s833_s11 = smov 8  }
   0xf   : > { %s834_s12 = smov [#allocation7]   ;;  %s924_s14 = sadd.s32 1, %s829_s21  }
  0x10   : > { %p599_p10 = pnand %p598_p9, %p43_p1  ;;  %s193_s13 = sshll.u32 %s834_s12, 4  ;;  %s194_s13 = int_to_ptr.vmem [resolvable:$true] %s193_s13 }
  0x11   : > { %s29_s15 = sadd.s32 1, %s825_s20  ;;  %s26_s16 = ssub.s32 %s829_s21, %s924_s14 }
  0x12   : > { %601 = dma.hbm_to_vmem [thread:$0]  (!%p599_p10), %s175_s28, 4096, %s177_s6, [#allocation6], %s832_s10, %s832_s10, %s833_s11  }
  0x13   : > { %604 = dma.hbm_to_vmem [thread:$0]  (!%p599_p10), %s192_s9, 2048, %s194_s13, [#allocation6], %s832_s10, %s832_s10, %s833_s11  }
  0x14   : > { %p36_p11 = scmp.ne.s32.totalorder %s825_s20, %s821_s19  ;;  %p27_p12 = scmp.eq.s32.totalorder %s26_s16, 0 }
  0x15   : > { %p37_p13 = scmp.eq.s32.totalorder %s829_s21, 0  ;;  %p615_p3 = scmp.lt.s32.totalorder %s829_s21, 4 }
  0x16   : > { %p934_p0 = por %p150_p2, %p36_p11  ;;  %s210_s26 = sand.u32 1, %s825_s20  }
  0x17   : > { %s940_s23 = scalar_select %p27_p12, %s825_s20, %s29_s15  }
  0x18   : > { %p38_p5 = por %p37_p13, %p36_p11  ;;  %s553_s27 = sshll.u32 %s210_s26, 6 }
  0x19   : > { %s568_s28 = sshll.u32 %s829_s21, 6  ;;  %s214_s8 = scalar_lea.vmem [#allocation2], %s553_s27 }
  0x1a   : > { %s220_s7 = scalar_lea.hbm %s1025_s0, %s568_s28  ;;  %s223_s9 = sshll.u32 %s214_s8, 4  ;;  %s224_s9 = int_to_ptr.vmem [resolvable:$true] %s223_s9 }
  0x1b   : > { %s221_s10 = sshll.u32 %s220_s7, 4  ;;  %p947_p2 = pnand %p615_p3, %p38_p5  ;;  %s222_s10 = int_to_ptr.hbm [resolvable:$true] %s221_s10 }
  0x1c   : > { %s211_s12 = scalar_lea.sflag [#allocation3], %s210_s26  ;;  %s729_s13 = sshra.s32 %s222_s10, 4  ;;  %s730_s13 = int_to_ptr.hbm [resolvable:$true] %s729_s13 }
  0x1d   : > { %s731_s15 = scalar_lea.hbm %s730_s13, 64  ;;  %p733_p9 = pneg %p947_p2 }
  0x1e   : > { %p732_p7 = scmp.ne.s32.totalorder %s730_s13, %s731_s15  ;;  %s736_s28 = scalar_lea.hbm %s1025_s0, 256 }
  0x1f   : > { %p737_p12 = scmp.lt.s32.totalorder %s730_s13, %s1025_s0  ;;  %p738_p13 = scmp.lt.s32.totalorder %s736_s28, %s731_s15 }
  0x20   : > { %p734_p10 = pnand %p733_p9, %p732_p7 }
  0x21   : > { %p739_p3 = por %p738_p13, %p737_p12 }
  0x22   : > { %p735_p11 = pneg %p734_p10 }
  0x24   : > { %p740_p5 = pnand %p739_p3, %p735_p11 }
  0x26   : > { %743 = shalt.err (!%p740_p5)
}
  0x27   : > { %s835_s26 = smov 256   ;;  %s836_s7 = smov 16  }
  0x28   : > { %608 = dma.hbm_to_vmem [thread:$0]  (!%p947_p2), %s222_s10, 1024, %s224_s9, %s211_s12, %s835_s26, %s835_s26, %s836_s7  }
  0x29   : > { %235 = sbr.rel (%p912_p8) target bundleno = 380 (0x17c), region = 40  ;;  %s964_s8 = sand.u32 (!%p912_p8), 1, %s821_s19  }
  0x2a   : > { %s558_s16 = sshll.u32 (!%p912_p8), %s964_s8, 6  ;;  %s238_s13 = scalar_lea.sflag (!%p912_p8), [#allocation3], %s964_s8 }
  0x2b   : > { %s968_s15 = scalar_lea.vmem (!%p912_p8), [#allocation2], %s558_s16 }
  0x2e   : > { %804 = dma.done.wait (%p899_p4), %s238_s13, 1024  }
  0x2f   : > { %806 = vsyncadd (%p899_p4), %s238_s13, 4294966272 }
  0x30   : > { %808 = dma.done.wait (%p43_p1), [#allocation6], 6144  }
  0x31   : > { %810 = vsyncadd (%p43_p1), [#allocation6], 4294961152  ;;  %v304_v0 = vld [vmem:[#allocation5 + $0x78] sm:$0xff]  ;;  %v303_v1 = vld [vmem:[#allocation5 + $0x70] sm:$0xff]  ;;  %s561_s9 = sshll.u32 %s964_s8, 5  ;;  %s569_s27 = sshll.u32 %s890_s22, 5 }
  0x32   : > { %v320_v2 = vld [vmem:[#allocation5 + $0xf8] sm:$0xff]  ;;  %325 = vmatpush.msra.mxu0 %v304_v0  ;;  %570 = vmatpush.msra.mxu3 %v304_v0  ;;  %v319_v3 = vld [vmem:[#allocation5 + $0xf0] sm:$0xff]  ;;  %v302_v4 = vld [vmem:[#allocation5 + $0x68] sm:$0xff]  ;;  %s278_s12 = scalar_lea.vmem [#allocation8], %s561_s9  ;;  %s452_s6 = scalar_lea.hbm %s1030_s5, %s569_s27 }
  0x33   : > { %354 = vmatpush.msra.mxu1 %v320_v2  ;;  %v318_v5 = vld [vmem:[#allocation5 + $0xe8] sm:$0xff]  ;;  %v301_v6 = vld [vmem:[#allocation5 + $0x60] sm:$0xff]  ;;  %v300_v8 = vld [vmem:[#allocation5 + $0x58] sm:$0xff]  ;;  %s453_s26 = sshll.u32 %s278_s12, 4  ;;  %s455_s7 = sshll.u32 %s452_s6, 4  ;;  %s454_s26 = int_to_ptr.vmem [resolvable:$true] %s453_s26  ;;  %s456_s7 = int_to_ptr.hbm [resolvable:$true] %s455_s7 }
  0x34   : > { %326 = vmatpush.msra.mxu0 %v303_v1  ;;  %571 = vmatpush.msra.mxu3 %v303_v1  ;;  %v317_v7 = vld [vmem:[#allocation5 + $0xe0] sm:$0xff]  ;;  %v316_v9 = vld [vmem:[#allocation5 + $0xd8] sm:$0xff]  ;;  %v299_v10 = vld [vmem:[#allocation5 + $0x50] sm:$0xff]  ;;  %s441_s16 = scalar_lea.sflag [#allocation4], %s964_s8  ;;  %s773_s13 = sshra.s32 %s456_s7, 4  ;;  %s774_s13 = int_to_ptr.hbm [resolvable:$true] %s773_s13 }
  0x35   : > { %355 = vmatpush.msra.mxu1 %v319_v3  ;;  %v315_v11 = vld [vmem:[#allocation5 + $0xd0] sm:$0xff]  ;;  %v298_v12 = vld [vmem:[#allocation5 + $0x48] sm:$0xff]  ;;  %v297_v14 = vld [vmem:[#allocation5 + $0x40] sm:$0xff]  ;;  %s779_s29 = scalar_lea.hbm %s1030_s5, 128  ;;  %p780_p2 = scmp.lt.s32.totalorder %s774_s13, %s1030_s5 }
  0x36   : > { %327 = vmatpush.msra.mxu0 %v302_v4  ;;  %572 = vmatpush.msra.mxu3 %v302_v4  ;;  %v314_v13 = vld [vmem:[#allocation5 + $0xc8] sm:$0xff]  ;;  %v313_v15 = vld [vmem:[#allocation5 + $0xc0] sm:$0xff]  ;;  %v296_v16 = vld [vmem:[#allocation5 + $0x38] sm:$0xff] }
  0x37   : > { %356 = vmatpush.msra.mxu1 %v318_v5  ;;  %v312_v17 = vld [vmem:[#allocation5 + $0xb8] sm:$0xff]  ;;  %v295_v18 = vld [vmem:[#allocation5 + $0x30] sm:$0xff]  ;;  %v294_v20 = vld [vmem:[#allocation5 + $0x28] sm:$0xff] }
  0x38   : > { %328 = vmatpush.msra.mxu0 %v301_v6  ;;  %573 = vmatpush.msra.mxu3 %v301_v6  ;;  %v311_v19 = vld [vmem:[#allocation5 + $0xb0] sm:$0xff]  ;;  %v310_v21 = vld [vmem:[#allocation5 + $0xa8] sm:$0xff]  ;;  %v293_v22 = vld [vmem:[#allocation5 + $0x20] sm:$0xff] }
  0x39   : > { %357 = vmatpush.msra.mxu1 %v317_v7  ;;  %v309_v23 = vld [vmem:[#allocation5 + $0xa0] sm:$0xff]  ;;  %v292_v24 = vld [vmem:[#allocation5 + $0x18] sm:$0xff]  ;;  %v291_v26 = vld [vmem:[#allocation5 + $0x10] sm:$0xff] }
  0x3a   : > { %329 = vmatpush.msra.mxu0 %v300_v8  ;;  %574 = vmatpush.msra.mxu3 %v300_v8  ;;  %v308_v25 = vld [vmem:[#allocation5 + $0x98] sm:$0xff]  ;;  %v307_v27 = vld [vmem:[#allocation5 + $0x90] sm:$0xff]  ;;  %v290_v30 = vld [vmem:[#allocation5 + $0x8] sm:$0xff] }
  0x3b   : > { %358 = vmatpush.msra.mxu1 %v316_v9  ;;  %v402_v28 = vld [vmem:[#allocation7 + $0x78] sm:$0xff]  ;;  %v401_v29 = vld [vmem:[#allocation7 + $0x70] sm:$0xff]  ;;  %v306_v31 = vld [vmem:[#allocation5 + $0x88] sm:$0xff] }
  0x3c   : > { %330 = vmatpush.msra.mxu0 %v299_v10  ;;  %575 = vmatpush.msra.mxu3 %v299_v10  ;;  %v400_v32 = vld [vmem:[#allocation7 + $0x68] sm:$0xff]  ;;  %v289_v33 = vld [vmem:[#allocation5] sm:$0xff]  ;;  %v283_v36 = vld [vmem:[%s968_s15 + $0x10] sm:$0xff] }
  0x3d   : > { %359 = vmatpush.msra.mxu1 %v315_v11  ;;  %407 = vmatpush.msra.mxu2 %v402_v28  ;;  %v281_v34 = vld [vmem:[%s968_s15] sm:$0xff]  ;;  %v282_v37 = vld [vmem:[%s968_s15 + $0x8] sm:$0xff]  ;;  %v398_v39 = vld [vmem:[#allocation7 + $0x58] sm:$0xff] }
  0x3e   : > { %331 = vmatpush.msra.mxu0 %v298_v12  ;;  %576 = vmatpush.msra.mxu3 %v298_v12  ;;  %v305_v35 = vld [vmem:[#allocation5 + $0x80] sm:$0xff]  ;;  %v397_v40 = vld [vmem:[#allocation7 + $0x50] sm:$0xff]  ;;  %v396_v41 = vld [vmem:[#allocation7 + $0x48] sm:$0xff] }
  0x3f   : > { %360 = vmatpush.msra.mxu1 %v314_v13  ;;  %408 = vmatpush.msra.mxu2 %v401_v29  ;;  %v399_v38 = vld [vmem:[#allocation7 + $0x60] sm:$0xff]  ;;  %v284_v43 = vld [vmem:[%s968_s15 + $0x18] sm:$0xff]  ;;  %v393_v46 = vld [vmem:[#allocation7 + $0x30] sm:$0xff] }
  0x40   : > { %332 = vmatpush.msra.mxu0 %v297_v14  ;;  %577 = vmatpush.msra.mxu3 %v297_v14  ;;  %v285_v42 = vld [vmem:[%s968_s15 + $0x20] sm:$0xff]  ;;  %v394_v45 = vld [vmem:[#allocation7 + $0x38] sm:$0xff]  ;;  %v287_v47 = vld [vmem:[%s968_s15 + $0x30] sm:$0xff] }
  0x41   : > { %361 = vmatpush.msra.mxu1 %v313_v15  ;;  %409 = vmatpush.msra.mxu2 %v400_v32  ;;  %v395_v44 = vld [vmem:[#allocation7 + $0x40] sm:$0xff]  ;;  %v286_v48 = vld [vmem:[%s968_s15 + $0x28] sm:$0xff]  ;;  %v288_v49 = vld [vmem:[%s968_s15 + $0x38] sm:$0xff]  ;;  %s775_s15 = scalar_lea.hbm %s774_s13, 32 }
  0x42   : > { %333 = vmatpush.msra.mxu0 %v296_v16  ;;  %578 = vmatpush.msra.mxu3 %v296_v16  ;;  %v392_v50 = vld [vmem:[#allocation7 + $0x28] sm:$0xff]  ;;  %v391_v51 = vld [vmem:[#allocation7 + $0x20] sm:$0xff]  ;;  %v390_v52 = vld [vmem:[#allocation7 + $0x18] sm:$0xff]  ;;  %p776_p1 = scmp.ne.s32.totalorder %s774_s13, %s775_s15  ;;  %p781_p7 = scmp.lt.s32.totalorder %s779_s29, %s775_s15 }
  0x43   : > { %362 = vmatpush.msra.mxu1 %v312_v17  ;;  %410 = vmatpush.msra.mxu2 %v399_v38  ;;  %v389_v53 = vld [vmem:[#allocation7 + $0x10] sm:$0xff]  ;;  %v388_v54 = vld [vmem:[#allocation7 + $0x8] sm:$0xff]  ;;  %v387_v55 = vld [vmem:[#allocation7] sm:$0xff] }
  0x44   : > { %334 = vmatpush.msra.mxu0 %v295_v18  ;;  %579 = vmatpush.msra.mxu3 %v295_v18  ;;  %v659_v56 = vld [vmem:[%s1027_s2] ss:$0 sm:$0xff]  ;;  %p777_p4 = pnand %p776_p1, %p934_p0  ;;  %p782_p9 = por %p781_p7, %p780_p2 }
  0x45   : > { %363 = vmatpush.msra.mxu1 %v311_v19  ;;  %411 = vmatpush.msra.mxu2 %v398_v39  ;;  %v660_v13 = vld [vmem:[%s1029_s4] ss:$0 sm:$0xff] }
  0x46   : > { %335 = vmatpush.msra.mxu0 %v294_v20  ;;  %580 = vmatpush.msra.mxu3 %v294_v20  ;;  %p778_p8 = pneg %p777_p4 }
  0x47   : > { %364 = vmatpush.msra.mxu1 %v310_v21  ;;  %412 = vmatpush.msra.mxu2 %v397_v40 }
  0x48   : > { %336 = vmatpush.msra.mxu0 %v293_v22  ;;  %581 = vmatpush.msra.mxu3 %v293_v22  ;;  %p783_p10 = pnand %p782_p9, %p778_p8 }
  0x49   : > { %365 = vmatpush.msra.mxu1 %v309_v23  ;;  %413 = vmatpush.msra.mxu2 %v396_v41 }
  0x4a   : > { %337 = vmatpush.msra.mxu0 %v292_v24  ;;  %582 = vmatpush.msra.mxu3 %v292_v24 }
  0x4b   : > { %366 = vmatpush.msra.mxu1 %v308_v25  ;;  %414 = vmatpush.msra.mxu2 %v395_v44 }
  0x4c   : > { %338 = vmatpush.msra.mxu0 %v291_v26  ;;  %583 = vmatpush.msra.mxu3 %v291_v26 }
  0x4d   : > { %367 = vmatpush.msra.mxu1 %v307_v27  ;;  %415 = vmatpush.msra.mxu2 %v394_v45 }
  0x4e   : > { %339 = vmatpush.msra.mxu0 %v290_v30  ;;  %584 = vmatpush.msra.mxu3 %v290_v30 }
  0x4f   : > { %368 = vmatpush.msra.mxu1 %v306_v31  ;;  %416 = vmatpush.msra.mxu2 %v393_v46 }
  0x50   : > { %340 = vmatpush.msra.mxu0 %v289_v33  ;;  %585 = vmatpush.msra.mxu3 %v289_v33 }
  0x51   : > { %341 = vmatmul.f32.vlgmr.msra.gmra.mxu0 %v281_v34  ;;  %369 = vmatpush.msra.mxu1 %v305_v35 }
  0x52   : > { %344 = vmatmul.f32.vlgmr.msra.gmra.mxu3 %v283_v36  ;;  %370 = vmatmul.f32.vlgmr.msra.gmra.mxu1 %v282_v37 }
  0x53   : > { %417 = vmatpush.msra.mxu2 %v392_v50 }
  0x55   : > { %418 = vmatpush.msra.mxu2 %v391_v51 }
  0x57   : > { %419 = vmatpush.msra.mxu2 %v390_v52 }
  0x59   : > { %420 = vmatpush.msra.mxu2 %v389_v53 }
  0x5a   : > { %347 = vmatmul.f32.gmra.mxu3 %v285_v42  ;;  %373 = vmatmul.f32.gmra.mxu1 %v284_v43 }
  0x5b   : > { %421 = vmatpush.msra.mxu2 %v388_v54 }
  0x5d   : > { %422 = vmatpush.msra.mxu2 %v387_v55 }
  0x62   : > { %350 = vmatmul.f32.gmra.mxu3 %v287_v47  ;;  %376 = vmatmul.f32.gmra.mxu1 %v286_v48 }
  0x6a   : > { %379 = vmatmul.f32.gmra.mxu1 %v288_v49 }
  0xce   : > { %v342_v57 = vpop.f32.mrf.mxu0 }
  0xcf   : > { %v343_v58 = vadd.f32 %v659_v56, %v342_v57  ;;  %v371_v59 = vpop.f32.mrf.mxu1 }
  0xd1   : > { %v372_v60 = vadd.f32 %v371_v59, %v343_v58 }
  0xd3   : > { %661 = vtanh.f32 %v372_v60 }
  0xd5   : > { %v345_v61 = vpop.f32.mrf.mxu3 }
  0xd6   : > { %v346_v62 = vadd.f32 %v659_v56, %v345_v61 }
  0xd7   : > { %v374_v63 = vpop.f32.mrf.mxu1 }
  0xd8   : > { %v375_v0 = vadd.f32 %v374_v63, %v346_v62 }
  0xd9   : > { %v662_v1 = vpop.eup %661 }
  0xda   : > { %663 = vtanh.f32 %v375_v0  ;;  %423 = vmatmul.f32.vlgmr.msra.gmra.mxu2 %v662_v1 }
  0xdd   : > { %v348_v2 = vpop.f32.mrf.mxu3 }
  0xde   : > { %v349_v3 = vadd.f32 %v659_v56, %v348_v2 }
  0xdf   : > { %v377_v4 = vpop.f32.mrf.mxu1 }
  0xe0   : > { %v664_v5 = vpop.eup %663  ;;  %v378_v6 = vadd.f32 %v377_v4, %v349_v3 }
  0xe2   : > { %665 = vtanh.f32 %v378_v6  ;;  %426 = vmatmul.f32.gmra.mxu2 %v664_v5 }
  0xe5   : > { %v351_v7 = vpop.f32.mrf.mxu3 }
  0xe6   : > { %v352_v8 = vadd.f32 %v659_v56, %v351_v7 }
  0xe7   : > { %v380_v9 = vpop.f32.mrf.mxu1 }
  0xe8   : > { %v666_v10 = vpop.eup %665  ;;  %v381_v11 = vadd.f32 %v380_v9, %v352_v8 }
  0xea   : > { %667 = vtanh.f32 %v381_v11  ;;  %429 = vmatmul.f32.gmra.mxu2 %v666_v10 }
  0xf0   : > { %v668_v12 = vpop.eup %667 }
  0xf2   : > { %432 = vmatmul.f32.gmra.mxu2 %v668_v12 }
 0x15d   : > { %v424_v14 = vpop.f32.mrf.mxu2 }
 0x15e   : > { %v425_v15 = vadd.f32 %v660_v13, %v424_v14 }
 0x160   : > { %436 = vst [vmem:[%s278_s12] sm:$0xff] %v425_v15 }
 0x165   : > { %v427_v16 = vpop.f32.mrf.mxu2 }
 0x166   : > { %v428_v17 = vadd.f32 %v660_v13, %v427_v16 }
 0x168   : > { %437 = vst [vmem:[%s278_s12 + $0x8] sm:$0xff] %v428_v17 }
 0x16d   : > { %v430_v18 = vpop.f32.mrf.mxu2 }
 0x16e   : > { %v431_v19 = vadd.f32 %v660_v13, %v430_v18 }
 0x170   : > { %438 = vst [vmem:[%s278_s12 + $0x10] sm:$0xff] %v431_v19 }
 0x175   : > { %v433_v20 = vpop.f32.mrf.mxu2 }
 0x176   : > { %v434_v21 = vadd.f32 %v660_v13, %v433_v20 }
 0x178   : > { %439 = vst [vmem:[%s278_s12 + $0x18] sm:$0xff] %v434_v21 }
 0x179   : > { %786 = shalt.err (!%p783_p10)
}
 0x17a   : > { %s837_s8 = smov 128   ;;  %s838_s11 = smov 8  }
 0x17b   : > { %596 = dma.vmem_to_hbm [thread:$0]  (%p934_p0), %s454_s26, 512, %s456_s7, %s441_s16, %s837_s8, %s837_s8, %s838_s11  }
 0x17c PF: > { %p618_p11 = scmp.ge.s32.totalorder %s829_s21, 2  ;;  %s470_s12 = sand.u32 1, %s817_s18  }
 0x17d   : > { %s471_s27 = scalar_lea.sflag [#allocation4], %s470_s12 }
 0x17e   : > { %p610_p12 = pnand %p618_p11, %p904_p6 }
 0x180   : > { %p611_p13 = pneg %p610_p12 }
 0x182   : > { %812 = dma.done.wait (%p611_p13), %s471_s27, 512  }
 0x183   : > { %814 = vsyncadd (%p611_p13), %s471_s27, 4294966784  ;;  %p19_p3 = scmp.ge.s32.totalorder %s924_s14, 6   ;;  %s1036_s18 = smov %s821_s19 }
 0x184   : > { %s1037_s19 = smov %s825_s20  ;;  %s1038_s20 = smov %s940_s23 }
 0x185   : > { %s1039_s21 = smov %s924_s14  ;;  %21 = sbr.rel (!%p19_p3) target bundleno = 6 (0x6), region = 93 }
 0x18a   :  { %477 = vsyncpa [#allocation3], 1 }
 0x18b   :  { %479 = vsyncpa [#allocation3 + $0x1], 1 }
 0x18c   :  { %480 = vsyncpa [#allocation6], 1 }
 0x18d   :  { %481 = vsyncpa [#allocation4], 1 }
 0x18e   :  { %483 = vsyncpa [#allocation4 + $0x1], 1 }

</bundles_post_ra>
